<compile_context>
chip_gen: v5e
topology: v5e:2x2
jax: 0.10.0
libtpu: 0.0.40
codegen_flags: <defaults>
</compile_context>

<pallas_src>
import functools

import jax
import jax.numpy as jnp
from jax.experimental import pallas as pl
from jax.experimental.pallas import tpu as pltpu


def _round_up(n, m):
    return ((n + m - 1) // m) * m


def actor_kernel(x_ref,
                 w1_ref, w2_ref, w3_ref, wmu_ref,
                 hbias_ref,    # (3, hidden)  : b1, b2, b3       (f32)
                 tail_ref,     # (3, act_pad) : b_mu, scale, shift (f32, zero-padded)
                 mu_ref):      # (TB, act_pad) f32, lane-dense output slab
    bf16 = jnp.bfloat16

    x = x_ref[...].astype(bf16)

    b1 = hbias_ref[0:1, :]
    b2 = hbias_ref[1:2, :]
    b3 = hbias_ref[2:3, :]
    b_mu = tail_ref[0:1, :]
    scale = tail_ref[1:2, :]
    shift = tail_ref[2:3, :]

    # MXU matmuls in bf16, f32 accumulation; all elementwise math in f32.
    h = jnp.dot(x, w1_ref[...], preferred_element_type=jnp.float32) + b1
    h = jnp.maximum(h, 0.0)

    h = jnp.dot(h.astype(bf16), w2_ref[...], preferred_element_type=jnp.float32) + b2
    h = jnp.maximum(h, 0.0)

    h = jnp.dot(h.astype(bf16), w3_ref[...], preferred_element_type=jnp.float32) + b3
    h = jnp.maximum(h, 0.0)

    mu = jnp.dot(h.astype(bf16), wmu_ref[...], preferred_element_type=jnp.float32) + b_mu
    mu = jnp.tanh(mu)

    # (mu + 1)/2*(high-low) + low  ==  mu*scale + shift  (folded in wrapper).
    mu_ref[...] = mu * scale + shift


def _resident_spec(a):
    """Whole array in VMEM, same block every grid step (stays resident)."""
    nd = a.ndim
    return pl.BlockSpec(a.shape, lambda i, nd=nd: (0,) * nd)


@functools.partial(jax.jit, static_argnames=("tb",))
def actor_forward(x, params, tb=4096):
    """ActorNet forward pass via a batch-tiled, lane-dense Pallas kernel."""
    B, obs_dim = x.shape
    hidden = params["w1"].shape[1]
    act_dim = params["w_mu"].shape[1]
    act_pad = _round_up(act_dim, 128)          # lane-dense output width

    # ---- batch tiling: few large steps, minimal padding -------------------
    n_steps = pl.cdiv(B, tb)
    if n_steps > 1 and n_steps % 2:
        n_steps += 1                           # even step count -> both v7x TCs busy
    TB = _round_up(pl.cdiv(B, n_steps), 8)     # sublane-aligned tile
    B_pad = TB * n_steps
    if B_pad != B:
        x = jnp.pad(x, ((0, B_pad - B), (0, 0)))
    grid = (n_steps,)

    # ---- one-time weight prep (bf16 MXU operands, padded/stacked consts) --
    bf16 = jnp.bfloat16
    w1 = params["w1"].astype(bf16)
    w2 = params["w2"].astype(bf16)
    w3 = params["w3"].astype(bf16)
    w_mu = jnp.zeros((hidden, act_pad), bf16).at[:, :act_dim].set(
        params["w_mu"].astype(bf16))

    # hidden-layer biases stacked into one operand
    h_bias = jnp.concatenate([params["b1"], params["b2"], params["b3"]], axis=0)

    # tail constants (b_mu, scale, shift) stacked & zero-padded to act_pad
    scale = 0.5 * (params["high"] - params["low"])   # (1, act_dim)
    shift = 0.5 * (params["high"] + params["low"])   # (1, act_dim)
    tail = jnp.zeros((3, act_pad), jnp.float32)
    tail = tail.at[0, :act_dim].set(params["b_mu"][0])
    tail = tail.at[1, :act_dim].set(scale[0])
    tail = tail.at[2, :act_dim].set(shift[0])

    weight_args = (w1, w2, w3, w_mu, h_bias, tail)

    in_specs = [pl.BlockSpec((TB, obs_dim), lambda i: (i, 0))]
    in_specs += [_resident_spec(a) for a in weight_args]
    out_spec = pl.BlockSpec((TB, act_pad), lambda i: (i, 0))

    # Advisory cost for XLA's scheduler around this small custom call.
    flops = 2 * B_pad * (obs_dim * hidden + 2 * hidden * hidden + hidden * act_pad)
    param_bytes = int(sum(a.dtype.itemsize * a.size for a in weight_args))
    bytes_accessed = 4 * B_pad * obs_dim + 4 * B_pad * act_pad + param_bytes
    cost = pl.CostEstimate(flops=flops,
                           transcendentals=B_pad * act_pad,   # tanh
                           bytes_accessed=bytes_accessed)

    mu_pad = pl.pallas_call(
        actor_kernel,
        out_shape=jax.ShapeDtypeStruct((B_pad, act_pad), jnp.float32),
        grid_spec=pltpu.PrefetchScalarGridSpec(
            num_scalar_prefetch=0,
            grid=grid,
            in_specs=in_specs,
            out_specs=out_spec,
        ),
        compiler_params=pltpu.CompilerParams(
            dimension_semantics=("parallel",),   # megacore: shard batch tiles
        ),
        cost_estimate=cost,
    )(x, *weight_args)

    mu = mu_pad[:B, :act_dim]
    # std is input-independent: compute in plain JAX (no kernel output needed).
    std = jnp.broadcast_to(jnp.exp(params["log_std"]), (B, act_dim))
    return mu, std


def init_params(key, obs_dim, act_dim, hidden_dim):
    """Deterministic synthetic parameters (PyTorch-Linear-like uniform init)."""
    def linear(k, fan_in, fan_out):
        kw, kb = jax.random.split(k)
        bound = 1.0 / jnp.sqrt(fan_in)
        w = jax.random.uniform(kw, (fan_in, fan_out), jnp.float32, -bound, bound)
        b = jax.random.uniform(kb, (1, fan_out), jnp.float32, -bound, bound)
        return w, b

    k1, k2, k3, k4 = jax.random.split(key, 4)
    w1, b1 = linear(k1, obs_dim, hidden_dim)
    w2, b2 = linear(k2, hidden_dim, hidden_dim)
    w3, b3 = linear(k3, hidden_dim, hidden_dim)
    w_mu, b_mu = linear(k4, hidden_dim, act_dim)

    return {
        "w1": w1, "b1": b1,
        "w2": w2, "b2": b2,
        "w3": w3, "b3": b3,
        "w_mu": w_mu, "b_mu": b_mu,
        # module constants (act_dim == 2 in the original module)
        "log_std": jnp.array([[-2.5, 0.22]], dtype=jnp.float32),
        "low": jnp.array([[-0.4, 0.0]], dtype=jnp.float32),
        "high": jnp.array([[0.4, 5.0]], dtype=jnp.float32),
    }


def reference_forward(x, p):
    """Plain-JAX f32 reference for correctness check."""
    h = jnp.maximum(x @ p["w1"] + p["b1"], 0.0)
    h = jnp.maximum(h @ p["w2"] + p["b2"], 0.0)
    h = jnp.maximum(h @ p["w3"] + p["b3"], 0.0)
    mu = jnp.tanh(h @ p["w_mu"] + p["b_mu"])
    mu = (mu + 1.0) * 0.5 * (p["high"] - p["low"]) + p["low"]
    std = jnp.broadcast_to(jnp.exp(p["log_std"]), mu.shape)
    return mu, std


if __name__ == "__main__":
    # Small shapes consistent with the module: obs vector -> MLP -> 2-dim action.
    B, OBS_DIM, ACT_DIM, HIDDEN = 8, 8, 2, 32

    key = jax.random.PRNGKey(0)
    k_params, k_x = jax.random.split(key)
    params = init_params(k_params, OBS_DIM, ACT_DIM, HIDDEN)
    x = jax.random.normal(k_x, (B, OBS_DIM), dtype=jnp.float32)

    mu, std = actor_forward(x, params)
    jax.block_until_ready((mu, std))

    mu_ref, std_ref = reference_forward(x, params)
    assert mu.shape == (B, ACT_DIM) and std.shape == (B, ACT_DIM)
    # Tolerance loosened vs. the f32 reference because matmul operands are bf16
    # (per perf review; acceptable for a PPO actor).
    assert jnp.allclose(mu, mu_ref, atol=3e-2, rtol=3e-2)
    assert jnp.allclose(std, std_ref, atol=1e-6, rtol=1e-6)

    print("KERNEL_OK")
</pallas_src>

<mosaic_0001>
module attributes {stable_mosaic.version = 11 : i64} {
  func.func @actor_kernel(%arg0: i32, %arg1: memref<8x8xf32, #tpu.memory_space<vmem>>, %arg2: memref<8x32xbf16, #tpu.memory_space<vmem>>, %arg3: memref<32x32xbf16, #tpu.memory_space<vmem>>, %arg4: memref<32x32xbf16, #tpu.memory_space<vmem>>, %arg5: memref<32x128xbf16, #tpu.memory_space<vmem>>, %arg6: memref<3x32xf32, #tpu.memory_space<vmem>>, %arg7: memref<3x128xf32, #tpu.memory_space<vmem>>, %arg8: memref<8x128xf32, #tpu.memory_space<vmem>>) attributes {dimension_semantics = [#tpu.dimension_semantics<parallel>], iteration_bounds = array<i64: 1>, scalar_prefetch = 0 : i64, scratch_operands = 0 : i64, tpu.core_type = #tpu.core_type<tc>, window_params = [{transform_indices = @transform_0, window_bounds = array<i64: 8, 8>}, {pipeline_mode = #tpu.pipeline_mode<synchronous>, transform_indices = @transform_1, window_bounds = array<i64: 8, 32>}, {pipeline_mode = #tpu.pipeline_mode<synchronous>, transform_indices = @transform_2, window_bounds = array<i64: 32, 32>}, {pipeline_mode = #tpu.pipeline_mode<synchronous>, transform_indices = @transform_3, window_bounds = array<i64: 32, 32>}, {pipeline_mode = #tpu.pipeline_mode<synchronous>, transform_indices = @transform_4, window_bounds = array<i64: 32, 128>}, {pipeline_mode = #tpu.pipeline_mode<synchronous>, transform_indices = @transform_5, window_bounds = array<i64: 3, 32>}, {pipeline_mode = #tpu.pipeline_mode<synchronous>, transform_indices = @transform_6, window_bounds = array<i64: 3, 128>}, {transform_indices = @transform_7, window_bounds = array<i64: 8, 128>}]} {
    %c0 = arith.constant 0 : index
    %c0_0 = arith.constant 0 : index
    %0 = vector.load %arg1[%c0, %c0_0] : memref<8x8xf32, #tpu.memory_space<vmem>>, vector<8x8xf32>
    %1 = arith.truncf %0 : vector<8x8xf32> to vector<8x8xbf16>
    %c0_1 = arith.constant 0 : index
    %c0_2 = arith.constant 0 : index
    %2 = vector.load %arg6[%c0_1, %c0_2] : memref<3x32xf32, #tpu.memory_space<vmem>>, vector<1x32xf32>
    %c1 = arith.constant 1 : index
    %c0_3 = arith.constant 0 : index
    %3 = vector.load %arg6[%c1, %c0_3] : memref<3x32xf32, #tpu.memory_space<vmem>>, vector<1x32xf32>
    %c2 = arith.constant 2 : index
    %c0_4 = arith.constant 0 : index
    %4 = vector.load %arg6[%c2, %c0_4] : memref<3x32xf32, #tpu.memory_space<vmem>>, vector<1x32xf32>
    %c0_5 = arith.constant 0 : index
    %c0_6 = arith.constant 0 : index
    %5 = vector.load %arg7[%c0_5, %c0_6] : memref<3x128xf32, #tpu.memory_space<vmem>>, vector<1x128xf32>
    %c1_7 = arith.constant 1 : index
    %c0_8 = arith.constant 0 : index
    %6 = vector.load %arg7[%c1_7, %c0_8] : memref<3x128xf32, #tpu.memory_space<vmem>>, vector<1x128xf32>
    %c2_9 = arith.constant 2 : index
    %c0_10 = arith.constant 0 : index
    %7 = vector.load %arg7[%c2_9, %c0_10] : memref<3x128xf32, #tpu.memory_space<vmem>>, vector<1x128xf32>
    %c0_11 = arith.constant 0 : index
    %c0_12 = arith.constant 0 : index
    %8 = vector.load %arg2[%c0_11, %c0_12] : memref<8x32xbf16, #tpu.memory_space<vmem>>, vector<8x32xbf16>
    %cst = arith.constant dense<0.000000e+00> : vector<8x32xf32>
    %9 = tpu.matmul %1, %8, %cst {dimension_numbers = #tpu.dot_dimension_numbers<[1], [0], [0], [1], [0, 0, 1, 1], [], []>} : vector<8x8xbf16>, vector<8x32xbf16>, vector<8x32xf32> -> vector<8x32xf32>
    %10 = vector.broadcast %2 : vector<1x32xf32> to vector<8x32xf32>
    %11 = arith.addf %9, %10 : vector<8x32xf32>
    %cst_13 = arith.constant 0.000000e+00 : f32
    %12 = vector.broadcast %cst_13 : f32 to vector<8x32xf32>
    %13 = arith.maximumf %11, %12 : vector<8x32xf32>
    %14 = arith.truncf %13 : vector<8x32xf32> to vector<8x32xbf16>
    %c0_14 = arith.constant 0 : index
    %c0_15 = arith.constant 0 : index
    %15 = vector.load %arg3[%c0_14, %c0_15] : memref<32x32xbf16, #tpu.memory_space<vmem>>, vector<32x32xbf16>
    %cst_16 = arith.constant dense<0.000000e+00> : vector<8x32xf32>
    %16 = tpu.matmul %14, %15, %cst_16 {dimension_numbers = #tpu.dot_dimension_numbers<[1], [0], [0], [1], [0, 0, 1, 1], [], []>} : vector<8x32xbf16>, vector<32x32xbf16>, vector<8x32xf32> -> vector<8x32xf32>
    %17 = vector.broadcast %3 : vector<1x32xf32> to vector<8x32xf32>
    %18 = arith.addf %16, %17 : vector<8x32xf32>
    %cst_17 = arith.constant 0.000000e+00 : f32
    %19 = vector.broadcast %cst_17 : f32 to vector<8x32xf32>
    %20 = arith.maximumf %18, %19 : vector<8x32xf32>
    %21 = arith.truncf %20 : vector<8x32xf32> to vector<8x32xbf16>
    %c0_18 = arith.constant 0 : index
    %c0_19 = arith.constant 0 : index
    %22 = vector.load %arg4[%c0_18, %c0_19] : memref<32x32xbf16, #tpu.memory_space<vmem>>, vector<32x32xbf16>
    %cst_20 = arith.constant dense<0.000000e+00> : vector<8x32xf32>
    %23 = tpu.matmul %21, %22, %cst_20 {dimension_numbers = #tpu.dot_dimension_numbers<[1], [0], [0], [1], [0, 0, 1, 1], [], []>} : vector<8x32xbf16>, vector<32x32xbf16>, vector<8x32xf32> -> vector<8x32xf32>
    %24 = vector.broadcast %4 : vector<1x32xf32> to vector<8x32xf32>
    %25 = arith.addf %23, %24 : vector<8x32xf32>
    %cst_21 = arith.constant 0.000000e+00 : f32
    %26 = vector.broadcast %cst_21 : f32 to vector<8x32xf32>
    %27 = arith.maximumf %25, %26 : vector<8x32xf32>
    %28 = arith.truncf %27 : vector<8x32xf32> to vector<8x32xbf16>
    %c0_22 = arith.constant 0 : index
    %c0_23 = arith.constant 0 : index
    %29 = vector.load %arg5[%c0_22, %c0_23] : memref<32x128xbf16, #tpu.memory_space<vmem>>, vector<32x128xbf16>
    %cst_24 = arith.constant dense<0.000000e+00> : vector<8x128xf32>
    %30 = tpu.matmul %28, %29, %cst_24 {dimension_numbers = #tpu.dot_dimension_numbers<[1], [0], [0], [1], [0, 0, 1, 1], [], []>} : vector<8x32xbf16>, vector<32x128xbf16>, vector<8x128xf32> -> vector<8x128xf32>
    %31 = vector.broadcast %5 : vector<1x128xf32> to vector<8x128xf32>
    %32 = arith.addf %30, %31 : vector<8x128xf32>
    %33 = math.tanh %32 : vector<8x128xf32>
    %34 = vector.broadcast %6 : vector<1x128xf32> to vector<8x128xf32>
    %35 = arith.mulf %33, %34 : vector<8x128xf32>
    %36 = vector.broadcast %7 : vector<1x128xf32> to vector<8x128xf32>
    %37 = arith.addf %35, %36 : vector<8x128xf32>
    %c0_25 = arith.constant 0 : index
    %c0_26 = arith.constant 0 : index
    %38 = vector.load %arg8[%c0_25, %c0_26] : memref<8x128xf32, #tpu.memory_space<vmem>>, vector<8x128xf32>
    tpu.vector_store %arg8[%c0_25, %c0_26], %37 {strides = array<i32>} : memref<8x128xf32, #tpu.memory_space<vmem>>, vector<8x128xf32>,
    return
  }
  func.func @transform_0(%arg0: i32) -> (i32, i32) {
    %c0_i32 = arith.constant 0 : i32
    %c0_i32_0 = arith.constant 0 : i32
    return %arg0, %c0_i32 : i32, i32
  }
  func.func @transform_1(%arg0: i32) -> (i32, i32) {
    %c0_i32 = arith.constant 0 : i32
    %c0_i32_0 = arith.constant 0 : i32
    %c0_i32_1 = arith.constant 0 : i32
    return %c0_i32, %c0_i32_0 : i32, i32
  }
  func.func @transform_2(%arg0: i32) -> (i32, i32) {
    %c0_i32 = arith.constant 0 : i32
    %c0_i32_0 = arith.constant 0 : i32
    %c0_i32_1 = arith.constant 0 : i32
    return %c0_i32, %c0_i32_0 : i32, i32
  }
  func.func @transform_3(%arg0: i32) -> (i32, i32) {
    %c0_i32 = arith.constant 0 : i32
    %c0_i32_0 = arith.constant 0 : i32
    %c0_i32_1 = arith.constant 0 : i32
    return %c0_i32, %c0_i32_0 : i32, i32
  }
  func.func @transform_4(%arg0: i32) -> (i32, i32) {
    %c0_i32 = arith.constant 0 : i32
    %c0_i32_0 = arith.constant 0 : i32
    %c0_i32_1 = arith.constant 0 : i32
    return %c0_i32, %c0_i32_0 : i32, i32
  }
  func.func @transform_5(%arg0: i32) -> (i32, i32) {
    %c0_i32 = arith.constant 0 : i32
    %c0_i32_0 = arith.constant 0 : i32
    %c0_i32_1 = arith.constant 0 : i32
    return %c0_i32, %c0_i32_0 : i32, i32
  }
  func.func @transform_6(%arg0: i32) -> (i32, i32) {
    %c0_i32 = arith.constant 0 : i32
    %c0_i32_0 = arith.constant 0 : i32
    %c0_i32_1 = arith.constant 0 : i32
    return %c0_i32, %c0_i32_0 : i32, i32
  }
  func.func @transform_7(%arg0: i32) -> (i32, i32) {
    %c0_i32 = arith.constant 0 : i32
    %c0_i32_0 = arith.constant 0 : i32
    return %arg0, %c0_i32 : i32, i32
  }
}

</mosaic_0001>

<bundles_post_ra>
// kernel: actor_forward.1
= control target key start
LH: loop header
LB: loop body
LE: loop exit
PB: predicated region body
PF: predicated region fallthrough
CT: control target
= control target key end

     0   :  { %vm41_vm0 = vcmask 1043456   ;;  %vm37_vm1 = vcmask 64512   ;;  %vm77_vm2 = vcmask 261120   ;;  %s304_s1 = inlined_call_operand.vmem [shape: bf16[8,32], index: 1, kind: input, shape index: {}]   ;;  %s305_s0 = inlined_call_operand.vmem [shape: f32[8,8], index: 0, kind: input, shape index: {}]   ;;  %s306_s5 = inlined_call_operand.vmem [shape: f32[3,32], index: 5, kind: input, shape index: {}]   ;;  %s307_s2 = inlined_call_operand.vmem [shape: bf16[32,32], index: 2, kind: input, shape index: {}]   ;;  %s308_s3 = inlined_call_operand.vmem [shape: bf16[32,32], index: 3, kind: input, shape index: {}]   ;;  %s309_s6 = inlined_call_operand.vmem [shape: f32[3,128], index: 6, kind: input, shape index: {}]   ;;  %s310_s4 = inlined_call_operand.vmem [shape: bf16[32,128], index: 4, kind: input, shape index: {}]   ;;  %s311_s7 = inlined_call_operand.vmem [shape: f32[8,128], index: 7, kind: output, shape index: {}]  }
   0x1   :  { %v35_v0 = vld [vmem:[%s304_s1] sm:$0xf]  ;;  %v203_v4 = vld [vmem:[%s307_s2 + $0x8] sm:$0xff] }
   0x2   :  { %v27_v1 = vld [vmem:[%s305_s0] sm:$0xff]  ;;  %v43_v2 = vsel %vm41_vm0, %v35_v0, 0  ;;  %87 = vmatpush.bf16.msra.mxu1 %v203_v4  ;;  %v205_v12 = vld [vmem:[%s308_s3 + $0x8] sm:$0xff] }
   0x3   :  { %v28_v3 = vpack.c.bf16 %v27_v1, %v27_v1  ;;  %52 = vmatpush.bf16.msra.mxu0 %v43_v2  ;;  %v202_v5 = vld [vmem:[%s307_s2] sm:$0xff]  ;;  %122 = vmatpush.bf16.msra.mxu2 %v205_v12  ;;  %v207_v20 = vld [vmem:[%s310_s4 + $0x8] sm:$0xff] }
   0x4   :  { %v208_v6 = vld [vmem:[%s306_s5] ss:$0 sm:$0xff]  ;;  %v209_v14 = vld [vmem:[%s306_s5 + $0x1] ss:$0 sm:$0xff]  ;;  %157 = vmatpush.bf16.msra.mxu3 %v207_v20  ;;  %v210_v22 = vld [vmem:[%s306_s5 + $0x2] ss:$0 sm:$0xff] }
   0x5   :  { %v204_v13 = vld [vmem:[%s308_s3] sm:$0xff] }
   0x6   :  { %174 = vmatmul.msk.bf16.vlgmr.msra.gmra.mxu0 %vm37_vm1, %v28_v3  ;;  %88 = vmatpush.bf16.msra.mxu1 %v202_v5  ;;  %v206_v21 = vld [vmem:[%s310_s4] sm:$0xff] }
   0x7   :  { %123 = vmatpush.bf16.msra.mxu2 %v204_v13  ;;  %v211_v28 = vld [vmem:[%s309_s6] ss:$0 sm:$0xff]  ;;  %v212_v31 = vld [vmem:[%s309_s6 + $0x1] ss:$0 sm:$0xff]  ;;  %v213_v32 = vld [vmem:[%s309_s6 + $0x2] ss:$0 sm:$0xff] }
   0x8   :  { %158 = vmatpush.bf16.msra.mxu3 %v206_v21 }
  0x83   :  { %v54_v7 = vpop.f32.mrf.mxu0 }
  0x84   :  { %v55_v8 = vadd.f32 %v208_v6, %v54_v7 }
  0x86   :  { %v58_v9 = vmax.f32 %v55_v8, 0.0 }
  0x88   :  { %v59_v10 = vpack.c.bf16 %v58_v9, %v58_v9 }
  0x8a   :  { %183 = vmatmul.msk.bf16.vlgmr.msra.gmra.mxu1 %vm77_vm2, %v59_v10 }
  0x8b   :  { %v56_v11 = vpop.f32.mrf.mxu0 }
 0x107   :  { %v90_v15 = vpop.f32.mrf.mxu1 }
 0x108   :  { %v91_v16 = vadd.f32 %v209_v14, %v90_v15 }
 0x10a   :  { %v94_v17 = vmax.f32 %v91_v16, 0.0 }
 0x10c   :  { %v95_v18 = vpack.c.bf16 %v94_v17, %v94_v17 }
 0x10e   :  { %192 = vmatmul.msk.bf16.vlgmr.msra.gmra.mxu2 %vm77_vm2, %v95_v18 }
 0x10f   :  { %v92_v19 = vpop.f32.mrf.mxu1 }
 0x191   :  { %v125_v23 = vpop.f32.mrf.mxu2 }
 0x192   :  { %v126_v24 = vadd.f32 %v210_v22, %v125_v23 }
 0x194   :  { %v129_v25 = vmax.f32 %v126_v24, 0.0 }
 0x196   :  { %v130_v26 = vpack.c.bf16 %v129_v25, %v129_v25 }
 0x198   :  { %201 = vmatmul.msk.bf16.vlgmr.msra.gmra.mxu3 %vm77_vm2, %v130_v26 }
 0x199   :  { %v127_v27 = vpop.f32.mrf.mxu2 }
 0x21b   :  { %v160_v29 = vpop.f32.mrf.mxu3 }
 0x21c   :  { %v161_v30 = vadd.f32 %v211_v28, %v160_v29 }
 0x21e   :  { %214 = vtanh.f32 %v161_v30 }
 0x223   :  { %v162_v33 = vpop.f32.mrf.mxu3 }
 0x224   :  { %v215_v34 = vpop.eup %214 }
 0x225   :  { %v166_v35 = vmul.f32 %v215_v34, %v212_v31 }
 0x227   :  { %v168_v36 = vadd.f32 %v213_v32, %v166_v35 }
 0x229   :  { %169 = vst [vmem:[%s311_s7] sm:$0xff] %v168_v36 }

</bundles_post_ra>
